<compile_context>
chip_gen: v7x
topology: tpu7x:2x2x1
jax: 0.10.0
libtpu: 0.0.40
codegen_flags: <defaults>
</compile_context>

<pallas_src>
import jax
import jax.numpy as jnp
from jax.experimental import pallas as pl
from jax.experimental.pallas import tpu as pltpu

HIDDEN_DIM = 128
_LN_EPS = 1e-5


def _round_up(n, m):
    return (n + m - 1) // m * m


def _default_parallel_tiles():
    # v7x has 2 TensorCores per chip -> keep ~2 "parallel" grid steps so both get work.
    # v5e / v6e are single-TC -> extra grid steps are pure serial per-step overhead.
    try:
        kind = jax.devices()[0].device_kind.lower()
        if "v7" in kind or "7x" in kind:
            return 2
    except Exception:
        pass
    return 1


def _pick_tm(B, n_tiles, cap=1024):
    # Row tile: multiple of 16 (covers bf16 sublane packing if x ever becomes bf16),
    # capped so double-buffered tiles stay tiny in VMEM on all generations.
    tm = _round_up(max(16, pl.cdiv(B, n_tiles)), 16)
    tm = min(tm, cap)
    if tm >= B:
        tm = B  # single full-height block: block dim == full array dim is always legal
    return tm


def encoder_kernel(x_ref, w1_ref, b1_ref, gamma_ref, beta_ref, w2_ref, b2_ref, o_ref):
    # ---- Linear 1 on the MXU: (tm, d_in) @ (d_in, H) -> (tm, H), f32 accumulation.
    # The bf16 cast of x is a VPU op hidden under the x DMA / matmul (no wrapper cast).
    x = x_ref[...].astype(w1_ref.dtype)
    h = jnp.dot(x, w1_ref[...], preferred_element_type=jnp.float32) + b1_ref[...]

    # ---- LayerNorm over the hidden axis: single-pass stats (two independent XLU
    # reductions overlap), biased variance + eps matches nn.LayerNorm. All f32.
    inv_n = 1.0 / h.shape[-1]
    mean = jnp.sum(h, axis=-1, keepdims=True) * inv_n
    mean_sq = jnp.sum(h * h, axis=-1, keepdims=True) * inv_n
    var = mean_sq - mean * mean
    h_norm = (h - mean) * jax.lax.rsqrt(var + _LN_EPS)
    h_norm = h_norm * gamma_ref[...] + beta_ref[...]

    # ---- ReLU (f32), then cast to the MXU dtype for the second matmul.
    a = jnp.maximum(h_norm, 0.0).astype(w2_ref.dtype)

    # ---- Linear 2: (tm, H) @ (H, d_out) -> (tm, d_out), f32 accumulation.
    out = jnp.dot(a, w2_ref[...], preferred_element_type=jnp.float32) + b2_ref[...]
    o_ref[...] = out.astype(o_ref.dtype)


def encoder_forward(x, w1, b1, gamma, beta, w2, b2, *, n_parallel_tiles=None, tm_cap=1024):
    B, d_in = x.shape
    H = w1.shape[1]
    d_out = w2.shape[1]
    out_dtype = x.dtype  # f32 output, matching the PyTorch module's semantics
    # TODO(synk): emit bf16 output (out_dtype=jnp.bfloat16) if downstream consumers
    # tolerate it — halves the dominant HBM writeback term on all generations.

    if n_parallel_tiles is None:
        n_parallel_tiles = _default_parallel_tiles()
    tm = _pick_tm(B, n_parallel_tiles, tm_cap)
    grid = (pl.cdiv(B, tm),)  # last block may be partial; OOB rows masked on store

    # VMEM guard (v7x: 64 MiB physical / 32 MiB scoped): resident weights +
    # double-buffered x and out tiles + in-kernel f32 activations, with headroom.
    vmem_bytes = (
        w1.size * w1.dtype.itemsize + w2.size * w2.dtype.itemsize
        + (b1.size + gamma.size + beta.size + b2.size) * 4
        + 2 * tm * d_in * x.dtype.itemsize                    # x tile, double-buffered
        + 2 * tm * d_out * jnp.dtype(out_dtype).itemsize      # out tile, double-buffered
        + 4 * tm * H * 4                                      # f32 activations headroom
    )
    assert vmem_bytes < 16 * 1024 * 1024, f"VMEM footprint too large: {vmem_bytes} bytes"

    flops = 2 * B * d_in * H + 2 * B * H * d_out
    bytes_accessed = (
        x.size * x.dtype.itemsize
        + B * d_out * jnp.dtype(out_dtype).itemsize
        + w1.size * w1.dtype.itemsize
        + w2.size * w2.dtype.itemsize
        + (b1.size + gamma.size + beta.size + b2.size) * 4
    )
    cost = pl.CostEstimate(
        flops=int(flops), transcendentals=int(B), bytes_accessed=int(bytes_accessed)
    )

    return pl.pallas_call(
        encoder_kernel,
        out_shape=jax.ShapeDtypeStruct((B, d_out), out_dtype),
        grid_spec=pl.GridSpec(
            grid=grid,
            in_specs=[
                pl.BlockSpec((tm, d_in), lambda i: (i, 0)),    # x row tile (streamed, f32)
                pl.BlockSpec((d_in, H), lambda i: (0, 0)),     # W1 (resident, bf16)
                pl.BlockSpec((1, H), lambda i: (0, 0)),        # b1
                pl.BlockSpec((1, H), lambda i: (0, 0)),        # LN gamma
                pl.BlockSpec((1, H), lambda i: (0, 0)),        # LN beta
                pl.BlockSpec((H, d_out), lambda i: (0, 0)),    # W2 (resident, bf16)
                pl.BlockSpec((1, d_out), lambda i: (0, 0)),    # b2
            ],
            out_specs=pl.BlockSpec((tm, d_out), lambda i: (i, 0)),
        ),
        compiler_params=pltpu.CompilerParams(dimension_semantics=("parallel",)),
        cost_estimate=cost,
    )(x, w1, b1, gamma, beta, w2, b2)


def init_params(key, input_dim, hidden_dim, output_dim, dtype=jnp.float32):
    k1, k2, k3, k4 = jax.random.split(key, 4)
    # Deterministic synthetic init (uniform, PyTorch-default Linear scale).
    lim1 = 1.0 / (input_dim ** 0.5)
    lim2 = 1.0 / (hidden_dim ** 0.5)
    w1 = jax.random.uniform(k1, (input_dim, hidden_dim), dtype, -lim1, lim1)
    b1 = jax.random.uniform(k2, (1, hidden_dim), dtype, -lim1, lim1)
    gamma = jnp.ones((1, hidden_dim), dtype)   # LayerNorm weight
    beta = jnp.zeros((1, hidden_dim), dtype)   # LayerNorm bias
    w2 = jax.random.uniform(k3, (hidden_dim, output_dim), dtype, -lim2, lim2)
    b2 = jax.random.uniform(k4, (1, output_dim), dtype, -lim2, lim2)
    return w1, b1, gamma, beta, w2, b2


def prepare_params(w1, b1, gamma, beta, w2, b2, mxu_dtype=jnp.bfloat16):
    """One-time parameter prep (bf16 weight casts) hoisted off the per-call hot path."""
    return w1.astype(mxu_dtype), b1, gamma, beta, w2.astype(mxu_dtype), b2


def encoder_ref(x, w1, b1, gamma, beta, w2, b2, mxu_dtype=None):
    """Pure-JAX reference. If mxu_dtype is set, matmul operands are cast like the kernel."""
    if mxu_dtype is not None:
        xm, w1m, w2m = x.astype(mxu_dtype), w1.astype(mxu_dtype), w2.astype(mxu_dtype)
    else:
        xm, w1m, w2m = x, w1, w2
    h = jnp.dot(xm, w1m, preferred_element_type=jnp.float32) + b1
    mean = jnp.mean(h, axis=-1, keepdims=True)
    var = jnp.mean((h - mean) ** 2, axis=-1, keepdims=True)
    hn = (h - mean) * jax.lax.rsqrt(var + _LN_EPS) * gamma + beta
    a = jnp.maximum(hn, 0.0)
    am = a.astype(mxu_dtype) if mxu_dtype is not None else a
    return jnp.dot(am, w2m, preferred_element_type=jnp.float32) + b2


if __name__ == "__main__":
    # Small shapes consistent with the module (hidden fixed at 128 by the spec).
    B, input_dim, output_dim = 96, 32, 32
    key = jax.random.PRNGKey(0)
    kx, kp = jax.random.split(key)

    x = jax.random.normal(kx, (B, input_dim), jnp.float32)
    raw_params = init_params(kp, input_dim, HIDDEN_DIM, output_dim)
    params = prepare_params(*raw_params)   # one-time bf16 weight cast, off the hot path

    out = jax.block_until_ready(encoder_forward(x, *params))
    assert out.shape == (B, output_dim)
    assert out.dtype == jnp.float32

    # Check 1: reference using the same bf16 matmul operands (validates kernel wiring).
    ref_bf16 = encoder_ref(x, *raw_params, mxu_dtype=jnp.bfloat16)
    assert jnp.allclose(out, ref_bf16, atol=1e-2, rtol=1e-2), "mismatch vs bf16-matched ref"

    # Check 2: full-f32 reference (only bf16 MXU rounding should differ).
    ref_f32 = encoder_ref(x, *raw_params)
    assert jnp.allclose(out, ref_f32, atol=5e-2, rtol=5e-2), "mismatch vs f32 reference"

    print("KERNEL_OK")
</pallas_src>

<mosaic_0001>
module attributes {stable_mosaic.version = 11 : i64} {
  func.func @encoder_kernel(%arg0: i32, %arg1: memref<96x32xf32, #tpu.memory_space<vmem>>, %arg2: memref<32x128xbf16, #tpu.memory_space<vmem>>, %arg3: memref<1x128xf32, #tpu.memory_space<vmem>>, %arg4: memref<1x128xf32, #tpu.memory_space<vmem>>, %arg5: memref<1x128xf32, #tpu.memory_space<vmem>>, %arg6: memref<128x32xbf16, #tpu.memory_space<vmem>>, %arg7: memref<1x32xf32, #tpu.memory_space<vmem>>, %arg8: memref<96x32xf32, #tpu.memory_space<vmem>>) attributes {dimension_semantics = [#tpu.dimension_semantics<parallel>], iteration_bounds = array<i64: 1>, scalar_prefetch = 0 : i64, scratch_operands = 0 : i64, tpu.core_type = #tpu.core_type<tc>, window_params = [{transform_indices = @transform_0, window_bounds = array<i64: 96, 32>}, {pipeline_mode = #tpu.pipeline_mode<synchronous>, transform_indices = @transform_1, window_bounds = array<i64: 32, 128>}, {pipeline_mode = #tpu.pipeline_mode<synchronous>, transform_indices = @transform_2, window_bounds = array<i64: 1, 128>}, {pipeline_mode = #tpu.pipeline_mode<synchronous>, transform_indices = @transform_3, window_bounds = array<i64: 1, 128>}, {pipeline_mode = #tpu.pipeline_mode<synchronous>, transform_indices = @transform_4, window_bounds = array<i64: 1, 128>}, {pipeline_mode = #tpu.pipeline_mode<synchronous>, transform_indices = @transform_5, window_bounds = array<i64: 128, 32>}, {pipeline_mode = #tpu.pipeline_mode<synchronous>, transform_indices = @transform_6, window_bounds = array<i64: 1, 32>}, {transform_indices = @transform_7, window_bounds = array<i64: 96, 32>}]} {
    %c0 = arith.constant 0 : index
    %c0_0 = arith.constant 0 : index
    %0 = vector.load %arg1[%c0, %c0_0] : memref<96x32xf32, #tpu.memory_space<vmem>>, vector<96x32xf32>
    %1 = arith.truncf %0 : vector<96x32xf32> to vector<96x32xbf16>
    %c0_1 = arith.constant 0 : index
    %c0_2 = arith.constant 0 : index
    %2 = vector.load %arg2[%c0_1, %c0_2] : memref<32x128xbf16, #tpu.memory_space<vmem>>, vector<32x128xbf16>
    %cst = arith.constant dense<0.000000e+00> : vector<96x128xf32>
    %3 = tpu.matmul %1, %2, %cst {dimension_numbers = #tpu.dot_dimension_numbers<[1], [0], [0], [1], [0, 0, 1, 1], [], []>} : vector<96x32xbf16>, vector<32x128xbf16>, vector<96x128xf32> -> vector<96x128xf32>
    %c0_3 = arith.constant 0 : index
    %c0_4 = arith.constant 0 : index
    %4 = vector.load %arg3[%c0_3, %c0_4] : memref<1x128xf32, #tpu.memory_space<vmem>>, vector<1x128xf32>
    %5 = vector.broadcast %4 : vector<1x128xf32> to vector<96x128xf32>
    %6 = arith.addf %3, %5 : vector<96x128xf32>
    %cst_5 = arith.constant dense<0.000000e+00> : vector<96xf32>
    %7 = vector.multi_reduction <add>, %6, %cst_5 [1] : vector<96x128xf32> to vector<96xf32>
    %8 = vector.shape_cast %7 : vector<96xf32> to vector<96x1xf32>
    %cst_6 = arith.constant 7.812500e-03 : f32
    %9 = vector.broadcast %cst_6 : f32 to vector<96x1xf32>
    %10 = arith.mulf %8, %9 : vector<96x1xf32>
    %11 = arith.mulf %6, %6 : vector<96x128xf32>
    %cst_7 = arith.constant dense<0.000000e+00> : vector<96xf32>
    %12 = vector.multi_reduction <add>, %11, %cst_7 [1] : vector<96x128xf32> to vector<96xf32>
    %13 = vector.shape_cast %12 : vector<96xf32> to vector<96x1xf32>
    %cst_8 = arith.constant 7.812500e-03 : f32
    %14 = vector.broadcast %cst_8 : f32 to vector<96x1xf32>
    %15 = arith.mulf %13, %14 : vector<96x1xf32>
    %16 = arith.mulf %10, %10 : vector<96x1xf32>
    %17 = arith.subf %15, %16 : vector<96x1xf32>
    %18 = vector.broadcast %10 : vector<96x1xf32> to vector<96x128xf32>
    %19 = arith.subf %6, %18 : vector<96x128xf32>
    %cst_9 = arith.constant 9.99999974E-6 : f32
    %20 = vector.broadcast %cst_9 : f32 to vector<96x1xf32>
    %21 = arith.addf %17, %20 : vector<96x1xf32>
    %22 = math.rsqrt %21 : vector<96x1xf32>
    %23 = vector.broadcast %22 : vector<96x1xf32> to vector<96x128xf32>
    %24 = arith.mulf %19, %23 : vector<96x128xf32>
    %c0_10 = arith.constant 0 : index
    %c0_11 = arith.constant 0 : index
    %25 = vector.load %arg4[%c0_10, %c0_11] : memref<1x128xf32, #tpu.memory_space<vmem>>, vector<1x128xf32>
    %26 = vector.broadcast %25 : vector<1x128xf32> to vector<96x128xf32>
    %27 = arith.mulf %24, %26 : vector<96x128xf32>
    %c0_12 = arith.constant 0 : index
    %c0_13 = arith.constant 0 : index
    %28 = vector.load %arg5[%c0_12, %c0_13] : memref<1x128xf32, #tpu.memory_space<vmem>>, vector<1x128xf32>
    %29 = vector.broadcast %28 : vector<1x128xf32> to vector<96x128xf32>
    %30 = arith.addf %27, %29 : vector<96x128xf32>
    %cst_14 = arith.constant 0.000000e+00 : f32
    %31 = vector.broadcast %cst_14 : f32 to vector<96x128xf32>
    %32 = arith.maximumf %30, %31 : vector<96x128xf32>
    %33 = arith.truncf %32 : vector<96x128xf32> to vector<96x128xbf16>
    %c0_15 = arith.constant 0 : index
    %c0_16 = arith.constant 0 : index
    %34 = vector.load %arg6[%c0_15, %c0_16] : memref<128x32xbf16, #tpu.memory_space<vmem>>, vector<128x32xbf16>
    %cst_17 = arith.constant dense<0.000000e+00> : vector<96x32xf32>
    %35 = tpu.matmul %33, %34, %cst_17 {dimension_numbers = #tpu.dot_dimension_numbers<[1], [0], [0], [1], [0, 0, 1, 1], [], []>} : vector<96x128xbf16>, vector<128x32xbf16>, vector<96x32xf32> -> vector<96x32xf32>
    %c0_18 = arith.constant 0 : index
    %c0_19 = arith.constant 0 : index
    %36 = vector.load %arg7[%c0_18, %c0_19] : memref<1x32xf32, #tpu.memory_space<vmem>>, vector<1x32xf32>
    %37 = vector.broadcast %36 : vector<1x32xf32> to vector<96x32xf32>
    %38 = arith.addf %35, %37 : vector<96x32xf32>
    %c0_20 = arith.constant 0 : index
    %c0_21 = arith.constant 0 : index
    %39 = vector.load %arg8[%c0_20, %c0_21] : memref<96x32xf32, #tpu.memory_space<vmem>>, vector<96x32xf32>
    tpu.vector_store %arg8[%c0_20, %c0_21], %38 {strides = array<i32>} : memref<96x32xf32, #tpu.memory_space<vmem>>, vector<96x32xf32>,
    return
  }
  func.func @transform_0(%arg0: i32) -> (i32, i32) {
    %c0_i32 = arith.constant 0 : i32
    %c0_i32_0 = arith.constant 0 : i32
    return %arg0, %c0_i32 : i32, i32
  }
  func.func @transform_1(%arg0: i32) -> (i32, i32) {
    %c0_i32 = arith.constant 0 : i32
    %c0_i32_0 = arith.constant 0 : i32
    %c0_i32_1 = arith.constant 0 : i32
    return %c0_i32, %c0_i32_0 : i32, i32
  }
  func.func @transform_2(%arg0: i32) -> (i32, i32) {
    %c0_i32 = arith.constant 0 : i32
    %c0_i32_0 = arith.constant 0 : i32
    %c0_i32_1 = arith.constant 0 : i32
    return %c0_i32, %c0_i32_0 : i32, i32
  }
  func.func @transform_3(%arg0: i32) -> (i32, i32) {
    %c0_i32 = arith.constant 0 : i32
    %c0_i32_0 = arith.constant 0 : i32
    %c0_i32_1 = arith.constant 0 : i32
    return %c0_i32, %c0_i32_0 : i32, i32
  }
  func.func @transform_4(%arg0: i32) -> (i32, i32) {
    %c0_i32 = arith.constant 0 : i32
    %c0_i32_0 = arith.constant 0 : i32
    %c0_i32_1 = arith.constant 0 : i32
    return %c0_i32, %c0_i32_0 : i32, i32
  }
  func.func @transform_5(%arg0: i32) -> (i32, i32) {
    %c0_i32 = arith.constant 0 : i32
    %c0_i32_0 = arith.constant 0 : i32
    %c0_i32_1 = arith.constant 0 : i32
    return %c0_i32, %c0_i32_0 : i32, i32
  }
  func.func @transform_6(%arg0: i32) -> (i32, i32) {
    %c0_i32 = arith.constant 0 : i32
    %c0_i32_0 = arith.constant 0 : i32
    %c0_i32_1 = arith.constant 0 : i32
    return %c0_i32, %c0_i32_0 : i32, i32
  }
  func.func @transform_7(%arg0: i32) -> (i32, i32) {
    %c0_i32 = arith.constant 0 : i32
    %c0_i32_0 = arith.constant 0 : i32
    return %arg0, %c0_i32 : i32, i32
  }
}

</mosaic_0001>

<bundles_post_ra>
// kernel: tpu_custom_call.1
= control target key start
LH: loop header
LB: loop body
LE: loop exit
PB: predicated region body
PF: predicated region fallthrough
CT: control target
= control target key end

     0   :  { %vm68_vm0 = vcmask 261120   ;;  %s1015_s1 = inlined_call_operand.vmem [shape: bf16[32,128], index: 1, kind: input, shape index: {}]   ;;  %s1016_s0 = inlined_call_operand.vmem [shape: f32[96,32], index: 0, kind: input, shape index: {}]   ;;  %s1017_s2 = inlined_call_operand.vmem [shape: f32[1,128], index: 2, kind: input, shape index: {}]   ;;  %s1018_s5 = inlined_call_operand.vmem [shape: bf16[128,32], index: 5, kind: input, shape index: {}]   ;;  %s1019_s3 = inlined_call_operand.vmem [shape: f32[1,128], index: 3, kind: input, shape index: {}]   ;;  %s1020_s4 = inlined_call_operand.vmem [shape: f32[1,128], index: 4, kind: input, shape index: {}]   ;;  %s1021_s6 = inlined_call_operand.vmem [shape: f32[1,32], index: 6, kind: input, shape index: {}]   ;;  %s1022_s7 = inlined_call_operand.vmem [shape: f32[96,32], index: 7, kind: output, shape index: {}]  }
   0x1   :  { %v650_v0 = vld [vmem:[%s1015_s1] sm:$0xff]   ;;  %v651_v1 = vld [vmem:[%s1015_s1 + $0x8] sm:$0xff]   ;;  %v29_v5 = vld [vmem:[%s1016_s0 + $0x10] sm:$0xff] }
   0x2   :  { %590 = vmatprep.subr.bf16.mxu0 %v650_v0  ;;  %v27_v2 = vld [vmem:[%s1016_s0] sm:$0xff]  ;;  %v28_v3 = vld [vmem:[%s1016_s0 + $0x8] sm:$0xff]  ;;  %v30_v6 = vld [vmem:[%s1016_s0 + $0x18] sm:$0xff] }
   0x3   :  { %591 = vmatpush3.bf16.msra.mxu0 %v650_v0  ;;  %v39_v4 = vpack.c.bf16 %v28_v3, %v27_v2  ;;  %v31_v7 = vld [vmem:[%s1016_s0 + $0x20] sm:$0xff]  ;;  %v32_v8 = vld [vmem:[%s1016_s0 + $0x28] sm:$0xff]  ;;  %v40_v9 = vpack.c.bf16 %v30_v6, %v29_v5  ;;  %v33_v11 = vld [vmem:[%s1016_s0 + $0x30] sm:$0xff] }
   0x4   :  { %592 = vmatprep.subr.bf16.mxu0 %v651_v1  ;;  %v41_v10 = vpack.c.bf16 %v32_v8, %v31_v7  ;;  %v34_v12 = vld [vmem:[%s1016_s0 + $0x38] sm:$0xff]  ;;  %v35_v13 = vld [vmem:[%s1016_s0 + $0x40] sm:$0xff]  ;;  %v36_v14 = vld [vmem:[%s1016_s0 + $0x48] sm:$0xff] }
   0x5   :  { %594 = vmatprep.mubr.msk.bf16.mxu0 %vm68_vm0, %v39_v4  ;;  %v42_v15 = vpack.c.bf16 %v34_v12, %v33_v11  ;;  %v43_v16 = vpack.c.bf16 %v36_v14, %v35_v13  ;;  %v37_v17 = vld [vmem:[%s1016_s0 + $0x50] sm:$0xff]  ;;  %v38_v18 = vld [vmem:[%s1016_s0 + $0x58] sm:$0xff]  ;;  %v775_v20 = vld [vmem:[%s1017_s2] ss:$0 sm:$0xff] }
   0x6   :  { %v44_v19 = vpack.c.bf16 %v38_v18, %v37_v17  ;;  %v652_v46 = vld [vmem:[%s1018_s5] sm:$0xff]   ;;  %v653_v49 = vld [vmem:[%s1018_s5 + $0x8] sm:$0xff]   ;;  %v654_v52 = vld [vmem:[%s1018_s5 + $0x10] sm:$0xff]  }
   0x7   :  { %593 = vmatpush3.bf16.msra.mxu0 %v651_v1  ;;  %634 = vmatprep.subr.bf16.mxu1 %v652_v46  ;;  %v655_v55 = vld [vmem:[%s1018_s5 + $0x18] sm:$0xff]   ;;  %v656_v58 = vld [vmem:[%s1018_s5 + $0x20] sm:$0xff]   ;;  %v657_v61 = vld [vmem:[%s1018_s5 + $0x28] sm:$0xff]  }
   0x8   :  { %606 = vmatprep.subr.bf16.mxu0 %v652_v46  ;;  %642 = vmatpush3.bf16.msra.mxu1 %v652_v46  ;;  %v658_v63 = vld [vmem:[%s1018_s5 + $0x30] sm:$0xff]   ;;  %v659_v0 = vld [vmem:[%s1018_s5 + $0x38] sm:$0xff]  }
   0x9   :  { %635 = vmatprep.subr.bf16.mxu1 %v653_v49 }
   0xa   :  { %595 = vmatmul.mubr.msk.bf16.vlgmr.msra.gmra.mrb[0].mxu0 %vm68_vm0, %v40_v9 }
   0xb   :  { %598 = vmatprep.mubr.msk.bf16.mxu0 %vm68_vm0, %v41_v10  ;;  %607 = vmatpush3.bf16.msra.mxu0 %v652_v46 }
   0xc   :  { %608 = vmatprep.subr.bf16.mxu0 %v653_v49  ;;  %643 = vmatpush3.bf16.msra.mxu1 %v653_v49 }
   0xd   :  { %636 = vmatprep.subr.bf16.mxu1 %v654_v52 }
   0xf   :  { %609 = vmatpush3.bf16.msra.mxu0 %v653_v49 }
  0x10   :  { %610 = vmatprep.subr.bf16.mxu0 %v654_v52  ;;  %644 = vmatpush3.bf16.msra.mxu1 %v654_v52 }
  0x11   :  { %637 = vmatprep.subr.bf16.mxu1 %v655_v55 }
  0x12   :  { %599 = vmatmul.mubr.msk.bf16.gmra.mrb[4].mxu0 %vm68_vm0, %v42_v15 }
  0x13   :  { %602 = vmatprep.mubr.msk.bf16.mxu0 %vm68_vm0, %v43_v16  ;;  %611 = vmatpush3.bf16.msra.mxu0 %v654_v52 }
  0x14   :  { %612 = vmatprep.subr.bf16.mxu0 %v655_v55  ;;  %645 = vmatpush3.bf16.msra.mxu1 %v655_v55 }
  0x15   :  { %638 = vmatprep.subr.bf16.mxu1 %v656_v58 }
  0x17   :  { %613 = vmatpush3.bf16.msra.mxu0 %v655_v55 }
  0x18   :  { %614 = vmatprep.subr.bf16.mxu0 %v656_v58  ;;  %646 = vmatpush3.bf16.msra.mxu1 %v656_v58 }
  0x19   :  { %639 = vmatprep.subr.bf16.mxu1 %v657_v61 }
  0x1a   :  { %603 = vmatmul.mubr.msk.bf16.gmra.mrb[8].mxu0 %vm68_vm0, %v44_v19 }
  0x1b   :  { %615 = vmatpush3.bf16.msra.mxu0 %v656_v58 }
  0x1c   :  { %616 = vmatprep.subr.bf16.mxu0 %v657_v61  ;;  %647 = vmatpush3.bf16.msra.mxu1 %v657_v61 }
  0x1d   :  { %640 = vmatprep.subr.bf16.mxu1 %v658_v63 }
  0x1f   :  { %617 = vmatpush3.bf16.msra.mxu0 %v657_v61 }
  0x20   :  { %618 = vmatprep.subr.bf16.mxu0 %v658_v63  ;;  %648 = vmatpush3.bf16.msra.mxu1 %v658_v63 }
  0x21   :  { %641 = vmatprep.subr.bf16.mxu1 %v659_v0 }
  0x23   :  { %619 = vmatpush3.bf16.msra.mxu0 %v658_v63 }
  0x24   :  { %620 = vmatprep.subr.bf16.mxu0 %v659_v0  ;;  %649 = vmatpush3.bf16.msra.mxu1 %v659_v0 }
  0x27   :  { %621 = vmatpush3.bf16.msra.mxu0 %v659_v0 }
  0xdd   :  { %v596_v21 = vpop.f32.mrb[0].mxu0 }
  0xde   :  { %v778_v22 = vadd.f32 %v596_v21, %v775_v20  ;;  %v121_v23 = vpop.f32.mrb[1].mxu0 }
  0xdf   :  { %v597_v24 = vpop.f32.mrb[2].mxu0  ;;  %v785_v27 = vadd.f32 %v775_v20, %v121_v23 }
  0xe0   :  { %v781_v25 = vadd.f32 %v597_v24, %v775_v20  ;;  %172 = vadd.xlane.f32.xlu0 %v778_v22  ;;  %v124_v26 = vpop.f32.mrb[3].mxu0  ;;  %v206_v30 = vmul.f32 %v778_v22, %v778_v22 }
  0xe1   :  { %v789_v28 = vadd.f32 %v775_v20, %v124_v26  ;;  %v204_v35 = vmul.f32 %v785_v27, %v785_v27 }
  0xe2   :  { %174 = vadd.xlane.f32.xlu1 %v781_v25  ;;  %v207_v33 = vmul.f32 %v781_v25, %v781_v25 }
  0xe3   :  { %v205_v38 = vmul.f32 %v789_v28, %v789_v28 }
  0xe4   :  { %168 = vadd.xlane.f32.xlu0 %v785_v27 }
  0xe5   :  { %v600_v29 = vpop.f32.mrb[4].mxu0 }
  0xe6   :  { %170 = vadd.xlane.f32.xlu1 %v789_v28  ;;  %v137_v31 = vpop.f32.mrb[5].mxu0  ;;  %v800_v36 = vadd.f32 %v600_v29, %v775_v20 }
  0xe7   :  { %v601_v32 = vpop.f32.mrb[6].mxu0  ;;  %v803_v37 = vadd.f32 %v775_v20, %v137_v31 }
  0xe8   :  { %220 = vadd.xlane.f32.xlu0 %v206_v30  ;;  %v140_v34 = vpop.f32.mrb[7].mxu0  ;;  %v210_v42 = vmul.f32 %v800_v36, %v800_v36  ;;  %v812_v44 = vadd.f32 %v601_v32, %v775_v20 }
  0xe9   :  { %v815_v45 = vadd.f32 %v775_v20, %v140_v34  ;;  %v208_v48 = vmul.f32 %v803_v37, %v803_v37 }
  0xea   :  { %222 = vadd.xlane.f32.xlu1 %v207_v33  ;;  %v211_v47 = vmul.f32 %v812_v44, %v812_v44 }
  0xeb   :  { %v209_v51 = vmul.f32 %v815_v45, %v815_v45 }
  0xec   :  { %216 = vadd.xlane.f32.xlu0 %v204_v35 }
  0xed   :  { %v604_v39 = vpop.f32.mrb[8].mxu0 }
  0xee   :  { %218 = vadd.xlane.f32.xlu1 %v205_v38  ;;  %v153_v40 = vpop.f32.mrb[9].mxu0  ;;  %v830_v50 = vadd.f32 %v604_v39, %v775_v20 }
  0xef   :  { %v605_v41 = vpop.f32.mrb[10].mxu0  ;;  %v842_v54 = vadd.f32 %v775_v20, %v153_v40 }
  0xf0   :  { %176 = vadd.xlane.f32.xlu0 %v803_v37  ;;  %v156_v43 = vpop.f32.mrb[11].mxu0  ;;  %v838_v53 = vadd.f32 %v605_v41, %v775_v20  ;;  %v214_v60 = vmul.f32 %v830_v50, %v830_v50 }
  0xf1   :  { %v849_v56 = vadd.f32 %v775_v20, %v156_v43  ;;  %v212_v57 = vmul.f32 %v842_v54, %v842_v54 }
  0xf2   :  { %180 = vadd.xlane.f32.xlu1 %v800_v36  ;;  %v215_v62 = vmul.f32 %v838_v53, %v838_v53 }
  0xf3   :  { %v213_v59 = vmul.f32 %v849_v56, %v849_v56 }
  0xf4   :  { %228 = vadd.xlane.f32.xlu0 %v210_v42 }
  0xf6   :  { %182 = vadd.xlane.f32.xlu1 %v812_v44 }
  0xf8   :  { %178 = vadd.xlane.f32.xlu0 %v815_v45 }
  0xfa   :  { %230 = vadd.xlane.f32.xlu1 %v211_v47 }
  0xfc   :  { %224 = vadd.xlane.f32.xlu0 %v208_v48 }
  0xfe   :  { %226 = vadd.xlane.f32.xlu1 %v209_v51 }
 0x100   :  { %188 = vadd.xlane.f32.xlu0 %v830_v50 }
 0x102   :  { %190 = vadd.xlane.f32.xlu1 %v838_v53 }
 0x104   :  { %184 = vadd.xlane.f32.xlu0 %v842_v54 }
 0x106   :  { %186 = vadd.xlane.f32.xlu1 %v849_v56 }
 0x108   :  { %232 = vadd.xlane.f32.xlu0 %v212_v57 }
 0x10a   :  { %234 = vadd.xlane.f32.xlu1 %v213_v59 }
 0x10c   :  { %236 = vadd.xlane.f32.xlu0 %v214_v60 }
 0x10e   :  { %238 = vadd.xlane.f32.xlu1 %v215_v62 }
 0x16d   :  { %v173_v1 = vpop.xlane.xlu0 %172 }
 0x16e   :  { %v194_v4 = vmul.f32 0.0078125, %v173_v1 }
 0x16f   :  { %v175_v2 = vpop.xlane.xlu1 %174 }
 0x170   :  { %v195_v6 = vmul.f32 0.0078125, %v175_v2  ;;  %v254_v8 = vmul.f32 %v194_v4, %v194_v4  ;;  %v278_v48 = vsub.f32 %v778_v22, %v194_v4  ;;  %v895_v22 = vld [vmem:[%s1019_s3] ss:$0 sm:$0xff] }
 0x171   :  { %v169_v3 = vpop.xlane.xlu0 %168 }
 0x172   :  { %v192_v9 = vmul.f32 0.0078125, %v169_v3  ;;  %v255_v13 = vmul.f32 %v195_v6, %v195_v6  ;;  %v279_v51 = vsub.f32 %v781_v25, %v195_v6 }
 0x173   :  { %v171_v5 = vpop.xlane.xlu1 %170 }
 0x174   :  { %v873_v11 = vmul.f32 0.0078125, %v171_v5  ;;  %v252_v17 = vmul.f32 %v192_v9, %v192_v9  ;;  %v276_v62 = vsub.f32 %v785_v27, %v192_v9 }
 0x175   :  { %v221_v7 = vpop.xlane.xlu0 %220 }
 0x176   :  { %v242_v10 = vmul.f32 0.0078125, %v221_v7  ;;  %v253_v21 = vmul.f32 %v873_v11, %v873_v11  ;;  %v277_v4 = vsub.f32 %v789_v28, %v873_v11  ;;  %v909_v28 = vld [vmem:[%s1020_s4] ss:$0 sm:$0xff] }
 0x177   :  { %v223_v12 = vpop.xlane.xlu1 %222 }
 0x178   :  { %v266_v14 = vsub.f32 %v242_v10, %v254_v8  ;;  %v243_v15 = vmul.f32 0.0078125, %v223_v12 }
 0x179   :  { %v217_v16 = vpop.xlane.xlu0 %216 }
 0x17a   :  { %v290_v18 = vadd.f32 1e-05, %v266_v14  ;;  %v267_v19 = vsub.f32 %v243_v15, %v255_v13  ;;  %v240_v20 = vmul.f32 0.0078125, %v217_v16 }
 0x17b   :  { %v219_v23 = vpop.xlane.xlu1 %218 }
 0x17c   :  { %660 = vrsqrt.f32 %v290_v18  ;;  %v291_v24 = vadd.f32 1e-05, %v267_v19  ;;  %v264_v26 = vsub.f32 %v240_v20, %v252_v17  ;;  %v241_v29 = vmul.f32 0.0078125, %v219_v23 }
 0x17d   :  { %v177_v30 = vpop.xlane.xlu0 %176 }
 0x17e   :  { %662 = vrsqrt.f32 %v291_v24  ;;  %v288_v31 = vadd.f32 1e-05, %v264_v26  ;;  %v265_v32 = vsub.f32 %v241_v29, %v253_v21  ;;  %v884_v49 = vmul.f32 0.0078125, %v177_v30 }
 0x17f   :  { %v181_v33 = vpop.xlane.xlu1 %180 }
 0x180   :  { %664 = vrsqrt.f32 %v288_v31  ;;  %v289_v34 = vadd.f32 1e-05, %v265_v32  ;;  %v877_v35 = vmul.f32 0.0078125, %v181_v33  ;;  %v256_v1 = vmul.f32 %v884_v49, %v884_v49 }
 0x181   :  { %v229_v38 = vpop.xlane.xlu0 %228 }
 0x182   :  { %666 = vrsqrt.f32 %v289_v34  ;;  %v246_v39 = vmul.f32 0.0078125, %v229_v38  ;;  %v258_v40 = vmul.f32 %v877_v35, %v877_v35 }
 0x183   :  { %v183_v41 = vpop.xlane.xlu1 %182 }
 0x184   :  { %v881_v42 = vmul.f32 0.0078125, %v183_v41  ;;  %v270_v43 = vsub.f32 %v246_v39, %v258_v40  ;;  %v282_v41 = vsub.f32 %v800_v36, %v877_v35 }
 0x185   :  { %v179_v46 = vpop.xlane.xlu0 %178 }
 0x186   :  { %v661_v47 = vpop.eup %660  ;;  %v294_v52 = vadd.f32 1e-05, %v270_v43  ;;  %v887_v55 = vmul.f32 0.0078125, %v179_v46  ;;  %v259_v60 = vmul.f32 %v881_v42, %v881_v42 }
 0x187   :  { %v231_v57 = vpop.xlane.xlu1 %230  ;;  %v314_v59 = vmul.f32 %v661_v47, %v278_v48 }
 0x188   :  { %v663_v58 = vpop.eup %662  ;;  %v247_v61 = vmul.f32 0.0078125, %v231_v57  ;;  %668 = vrsqrt.f32 %v294_v52  ;;  %v257_v27 = vmul.f32 %v887_v55, %v887_v55  ;;  %v283_v57 = vsub.f32 %v812_v44, %v881_v42 }
 0x189   :  { %v315_v63 = vmul.f32 %v663_v58, %v279_v51  ;;  %v225_v0 = vpop.xlane.xlu0 %224  ;;  %v333_v13 = vmul.f32 %v895_v22, %v314_v59 }
 0x18a   :  { %v665_v25 = vpop.eup %664  ;;  %v271_v2 = vsub.f32 %v247_v61, %v259_v60  ;;  %v244_v3 = vmul.f32 0.0078125, %v225_v0  ;;  %v281_v0 = vsub.f32 %v815_v45, %v887_v55 }
 0x18b   :  { %v227_v5 = vpop.xlane.xlu1 %226  ;;  %v312_v6 = vmul.f32 %v665_v25, %v276_v62  ;;  %v334_v7 = vmul.f32 %v895_v22, %v315_v63  ;;  %v352_v24 = vadd.f32 %v909_v28, %v333_v13  ;;  %v280_v63 = vsub.f32 %v803_v37, %v884_v49 }
 0x18c   :  { %v667_v8 = vpop.eup %666  ;;  %v295_v9 = vadd.f32 1e-05, %v271_v2  ;;  %v268_v10 = vsub.f32 %v244_v3, %v256_v1  ;;  %v245_v12 = vmul.f32 0.0078125, %v227_v5 }
 0x18d   :  { %v189_v14 = vpop.xlane.xlu0 %188  ;;  %v313_v15 = vmul.f32 %v667_v8, %v277_v4  ;;  %v331_v16 = vmul.f32 %v895_v22, %v312_v6  ;;  %v353_v18 = vadd.f32 %v909_v28, %v334_v7  ;;  %v364_v40 = vmax.f32 %v352_v24, 0.0 }
 0x18e   :  { %670 = vrsqrt.f32 %v295_v9  ;;  %v292_v11 = vadd.f32 1e-05, %v268_v10  ;;  %v269_v17 = vsub.f32 %v245_v12, %v257_v27  ;;  %v922_v47 = vmul.f32 0.0078125, %v189_v14 }
 0x18f   :  { %v191_v19 = vpop.xlane.xlu1 %190  ;;  %v332_v20 = vmul.f32 %v895_v22, %v313_v15  ;;  %v350_v21 = vadd.f32 %v909_v28, %v331_v16  ;;  %v365_v31 = vmax.f32 %v353_v18, 0.0 }
 0x190   :  { %672 = vrsqrt.f32 %v292_v11  ;;  %v293_v23 = vadd.f32 1e-05, %v269_v17  ;;  %v928_v58 = vmul.f32 0.0078125, %v191_v19  ;;  %v262_v1 = vmul.f32 %v922_v47, %v922_v47 }
 0x191   :  { %v185_v26 = vpop.xlane.xlu0 %184  ;;  %v351_v29 = vadd.f32 %v909_v28, %v332_v20  ;;  %v362_v33 = vmax.f32 %v350_v21, 0.0  ;;  %v375_v52 = vpack.c.bf16 %v365_v31, %v364_v40 }
 0x192   :  { %674 = vrsqrt.f32 %v293_v23  ;;  %v916_v30 = vmul.f32 0.0078125, %v185_v26  ;;  %v669_v38 = vpop.eup %668  ;;  %v263_v27 = vmul.f32 %v928_v58, %v928_v58 }
 0x193   :  { %v187_v32 = vpop.xlane.xlu1 %186  ;;  %v363_v34 = vmax.f32 %v351_v29, 0.0  ;;  %v318_v60 = vmul.f32 %v669_v38, %v282_v41  ;;  %v286_v38 = vsub.f32 %v830_v50, %v922_v47 }
 0x194   :  { %v918_v39 = vmul.f32 0.0078125, %v187_v32  ;;  %v260_v48 = vmul.f32 %v916_v30, %v916_v30  ;;  %v284_v24 = vsub.f32 %v842_v54, %v916_v30  ;;  %v287_v54 = vsub.f32 %v838_v53, %v928_v58 }
 0x195   :  { %v233_v43 = vpop.xlane.xlu0 %232  ;;  %v374_v46 = vpack.c.bf16 %v363_v34, %v362_v33  ;;  %v337_v7 = vmul.f32 %v895_v22, %v318_v60 }
 0x196   :  { %v248_v51 = vmul.f32 0.0078125, %v233_v43  ;;  %v261_v36 = vmul.f32 %v918_v39, %v918_v39  ;;  %v285_v32 = vsub.f32 %v849_v56, %v918_v39 }
 0x197   :  { %v235_v59 = vpop.xlane.xlu1 %234  ;;  %622 = vmatprep.mubr.bf16.mxu0 %v374_v46  ;;  %v356_v17 = vadd.f32 %v909_v28, %v337_v7 }
 0x198   :  { %v671_v61 = vpop.eup %670  ;;  %v272_v35 = vsub.f32 %v248_v51, %v260_v48  ;;  %v249_v62 = vmul.f32 0.0078125, %v235_v59  ;;  %623 = vmatmul.mubr.bf16.vlgmr.msra.gmra.mrb[12].mxu0 %v375_v52 }
 0x199   :  { %v237_v25 = vpop.xlane.xlu0 %236  ;;  %v319_v44 = vmul.f32 %v671_v61, %v283_v57  ;;  %v368_v23 = vmax.f32 %v356_v17, 0.0 }
 0x19a   :  { %v673_v42 = vpop.eup %672  ;;  %v296_v2 = vadd.f32 1e-05, %v272_v35  ;;  %v273_v3 = vsub.f32 %v249_v62, %v261_v36  ;;  %v250_v4 = vmul.f32 0.0078125, %v237_v25  ;;  %v559_v35 = vld [vmem:[%s1021_s6] ss:$0 sm:$0xff] }
 0x19b   :  { %v239_v5 = vpop.xlane.xlu1 %238  ;;  %v316_v6 = vmul.f32 %v673_v42, %v280_v63  ;;  %v338_v37 = vmul.f32 %v895_v22, %v319_v44 }
 0x19c   :  { %v675_v49 = vpop.eup %674  ;;  %676 = vrsqrt.f32 %v296_v2  ;;  %v297_v45 = vadd.f32 1e-05, %v273_v3  ;;  %v274_v55 = vsub.f32 %v250_v4, %v262_v1  ;;  %v251_v8 = vmul.f32 0.0078125, %v239_v5 }
 0x19d   :  { %v317_v9 = vmul.f32 %v675_v49, %v281_v0  ;;  %v335_v10 = vmul.f32 %v895_v22, %v316_v6  ;;  %v357_v14 = vadd.f32 %v909_v28, %v338_v37 }
 0x19e   :  { %678 = vrsqrt.f32 %v297_v45  ;;  %v298_v12 = vadd.f32 1e-05, %v274_v55  ;;  %v275_v13 = vsub.f32 %v251_v8, %v263_v27 }
 0x19f   :  { %v336_v15 = vmul.f32 %v895_v22, %v317_v9  ;;  %v354_v16 = vadd.f32 %v909_v28, %v335_v10  ;;  %v369_v19 = vmax.f32 %v357_v14, 0.0 }
 0x1a0   :  { %680 = vrsqrt.f32 %v298_v12  ;;  %v299_v11 = vadd.f32 1e-05, %v275_v13 }
 0x1a1   :  { %v355_v18 = vadd.f32 %v909_v28, %v336_v15  ;;  %v366_v20 = vmax.f32 %v354_v16, 0.0  ;;  %v377_v31 = vpack.c.bf16 %v369_v19, %v368_v23 }
 0x1a2   :  { %682 = vrsqrt.f32 %v299_v11 }
 0x1a3   :  { %v367_v21 = vmax.f32 %v355_v18, 0.0 }
 0x1a5   :  { %v376_v26 = vpack.c.bf16 %v367_v21, %v366_v20 }
 0x1a6   :  { %v677_v29 = vpop.eup %676 }
 0x1a7   :  { %626 = vmatprep.mubr.bf16.mxu1 %v376_v26  ;;  %v320_v33 = vmul.f32 %v677_v29, %v284_v24 }
 0x1a8   :  { %v679_v34 = vpop.eup %678  ;;  %627 = vmatmul.mubr.bf16.vlgmr.msra.gmra.mrb[0].mxu1 %v377_v31 }
 0x1a9   :  { %v321_v40 = vmul.f32 %v679_v34, %v285_v32  ;;  %v339_v41 = vmul.f32 %v895_v22, %v320_v33 }
 0x1aa   :  { %v681_v43 = vpop.eup %680 }
 0x1ab   :  { %v340_v30 = vmul.f32 %v895_v22, %v321_v40  ;;  %v358_v46 = vadd.f32 %v909_v28, %v339_v41  ;;  %v322_v48 = vmul.f32 %v681_v43, %v286_v38 }
 0x1ac   :  { %v683_v56 = vpop.eup %682 }
 0x1ad   :  { %v359_v39 = vadd.f32 %v909_v28, %v340_v30  ;;  %v323_v51 = vmul.f32 %v683_v56, %v287_v54  ;;  %v341_v52 = vmul.f32 %v895_v22, %v322_v48  ;;  %v370_v57 = vmax.f32 %v358_v46, 0.0 }
 0x1af   :  { %v371_v50 = vmax.f32 %v359_v39, 0.0  ;;  %v342_v47 = vmul.f32 %v895_v22, %v323_v51  ;;  %v360_v59 = vadd.f32 %v909_v28, %v341_v52 }
 0x1b1   :  { %v378_v60 = vpack.c.bf16 %v371_v50, %v370_v57  ;;  %v361_v53 = vadd.f32 %v909_v28, %v342_v47  ;;  %v372_v58 = vmax.f32 %v360_v59, 0.0 }
 0x1b3   :  { %630 = vmatprep.mubr.bf16.mxu1 %v378_v60  ;;  %v373_v61 = vmax.f32 %v361_v53, 0.0 }
 0x1b5   :  { %v379_v36 = vpack.c.bf16 %v373_v61, %v372_v58 }
 0x1b7   :  { %631 = vmatmul.mubr.bf16.gmra.mrb[4].mxu1 %v379_v36 }
 0x26b   :  { %v624_v62 = vpop.f32.mrb[12].mxu0 }
 0x26c   :  { %v494_v63 = vadd.f32 %v624_v62, %v559_v35  ;;  %v485_v0 = vpop.f32.mrb[13].mxu0 }
 0x26d   :  { %v486_v25 = vadd.f32 %v559_v35, %v485_v0  ;;  %v625_v44 = vpop.f32.mrb[14].mxu0 }
 0x26e   :  { %534 = vst.msk [vmem:[%s1022_s7 + $0x10] sm:$0xff] %vm68_vm0, %v494_v63  ;;  %v497_v22 = vadd.f32 %v625_v44, %v559_v35  ;;  %v488_v28 = vpop.f32.mrb[15].mxu0 }
 0x26f   :  { %532 = vst.msk [vmem:[%s1022_s7] sm:$0xff] %vm68_vm0, %v486_v25  ;;  %v489_v42 = vadd.f32 %v559_v35, %v488_v28 }
 0x270   :  { %535 = vst.msk [vmem:[%s1022_s7 + $0x18] sm:$0xff] %vm68_vm0, %v497_v22 }
 0x271   :  { %533 = vst.msk [vmem:[%s1022_s7 + $0x8] sm:$0xff] %vm68_vm0, %v489_v42 }
 0x27b   :  { %v628_v1 = vpop.f32.mrb[0].mxu1 }
 0x27c   :  { %v510_v2 = vadd.f32 %v628_v1, %v559_v35  ;;  %v501_v3 = vpop.f32.mrb[1].mxu1 }
 0x27d   :  { %v502_v4 = vadd.f32 %v559_v35, %v501_v3  ;;  %v629_v27 = vpop.f32.mrb[2].mxu1 }
 0x27e   :  { %538 = vst.msk [vmem:[%s1022_s7 + $0x30] sm:$0xff] %vm68_vm0, %v510_v2  ;;  %v513_v5 = vadd.f32 %v629_v27, %v559_v35  ;;  %v504_v6 = vpop.f32.mrb[3].mxu1 }
 0x27f   :  { %536 = vst.msk [vmem:[%s1022_s7 + $0x20] sm:$0xff] %vm68_vm0, %v502_v4  ;;  %v505_v7 = vadd.f32 %v559_v35, %v504_v6 }
 0x280   :  { %539 = vst.msk [vmem:[%s1022_s7 + $0x38] sm:$0xff] %vm68_vm0, %v513_v5 }
 0x281   :  { %537 = vst.msk [vmem:[%s1022_s7 + $0x28] sm:$0xff] %vm68_vm0, %v505_v7 }
 0x28a   :  { %v632_v37 = vpop.f32.mrb[4].mxu1 }
 0x28b   :  { %v526_v49 = vadd.f32 %v632_v37, %v559_v35  ;;  %v517_v45 = vpop.f32.mrb[5].mxu1 }
 0x28c   :  { %v518_v55 = vadd.f32 %v559_v35, %v517_v45  ;;  %v633_v8 = vpop.f32.mrb[6].mxu1 }
 0x28d   :  { %542 = vst.msk [vmem:[%s1022_s7 + $0x50] sm:$0xff] %vm68_vm0, %v526_v49  ;;  %v529_v9 = vadd.f32 %v633_v8, %v559_v35  ;;  %v520_v10 = vpop.f32.mrb[7].mxu1 }
 0x28e   :  { %540 = vst.msk [vmem:[%s1022_s7 + $0x40] sm:$0xff] %vm68_vm0, %v518_v55  ;;  %v521_v12 = vadd.f32 %v559_v35, %v520_v10 }
 0x28f   :  { %543 = vst.msk [vmem:[%s1022_s7 + $0x58] sm:$0xff] %vm68_vm0, %v529_v9 }
 0x290   :  { %541 = vst.msk [vmem:[%s1022_s7 + $0x48] sm:$0xff] %vm68_vm0, %v521_v12 }

</bundles_post_ra>
